<compile_context>
chip_gen: v6e
topology: v6e:2x2x1
jax: 0.10.0
libtpu: 0.0.40
codegen_flags: <defaults>
</compile_context>

<pallas_src>
import jax
import jax.numpy as jnp
from jax.experimental import pallas as pl
from jax.experimental.pallas import tpu as pltpu

# Module constants (shapes implied by BatchNorm1d(5) and AvgPool1d(8,1,0)).
B, C, L = 2, 5, 16           # batch, channels, sequence length
POOL_K = 8
L_OUT = L - POOL_K + 1       # 9
INPUT_SIZE = C * L_OUT       # 45 = Linear in_features
N_CLASSES = 10
BN_EPS = 1e-3
DROPOUT_P = 0.5              # identity in eval mode

K_RAW = C * L                # 80  (un-pooled flattened input length)
K_PAD = 128                  # padded contraction dim (lane-aligned); col 80 = bias column
M_PAD = 16                   # padded batch rows: full native bf16 (16,128) tile
N_PAD = 128                  # lane-dense padded output width


def i3d_classifier_kernel(x_ref, w_ref, out_ref):
    """Fully-fused forward: (M_PAD, K_PAD)bf16 @ (K_PAD, N_PAD)bf16 -> f32.

    AvgPool1d, BatchNorm1d(eval), Flatten, Dropout(eval) and the Linear bias
    have all been folded into w_ref / the augmented 1.0 column of x_ref, so
    the body is a single MXU push with an unmasked lane-dense store.
    """
    out_ref[...] = jnp.dot(
        x_ref[...], w_ref[...], preferred_element_type=jnp.float32
    )


def prepare_params(gamma, beta, running_mean, running_var, w, b):
    """One-time (model-load) folding of AvgPool + BatchNorm(eval) + bias into
    a single augmented bf16 weight matrix (K_PAD, N_PAD)."""
    # BatchNorm1d eval: y = x * scale + shift (per channel)
    inv_std = 1.0 / jnp.sqrt(running_var + BN_EPS)
    scale = gamma * inv_std                               # (C,)
    shift = beta - running_mean * scale                   # (C,)

    # Linear weight (N, C*L_OUT) -> (C, L_OUT, N), matching Flatten's
    # row-major (c, t) ordering.
    w3 = jnp.transpose(w.reshape(N_CLASSES, C, L_OUT), (1, 2, 0))   # (C, L_OUT, N)

    # Fold BN affine into weight / bias.
    w_eff = w3 * scale[:, None, None]                     # (C, L_OUT, N)
    b_eff = b + jnp.einsum("c,ctn->n", shift, w3)         # (N,)

    # Fold AvgPool1d(kernel=8, stride=1): pooled[t] = (1/8) * sum_{l=t..t+7} x[l]
    t_idx = jnp.arange(L_OUT)[:, None]
    l_idx = jnp.arange(L)[None, :]
    pool_mat = ((l_idx >= t_idx) & (l_idx < t_idx + POOL_K)).astype(jnp.float32)
    pool_mat = pool_mat / POOL_K                          # (L_OUT, L)
    w_full = jnp.einsum("tl,ctn->cln", pool_mat, w_eff).reshape(K_RAW, N_CLASSES)

    # Augmented weight: rows 0..K_RAW-1 = weights, row K_RAW = bias, rest 0.
    w_aug = jnp.zeros((K_PAD, N_PAD), jnp.float32)
    w_aug = w_aug.at[:K_RAW, :N_CLASSES].set(w_full)
    w_aug = w_aug.at[K_RAW, :N_CLASSES].set(b_eff)
    return w_aug.astype(jnp.bfloat16)


_i3d_call = pl.pallas_call(
    i3d_classifier_kernel,
    out_shape=jax.ShapeDtypeStruct((M_PAD, N_PAD), jnp.float32),
    in_specs=[
        pl.BlockSpec(memory_space=pltpu.MemorySpace.VMEM),  # x_pad (M_PAD, K_PAD) bf16
        pl.BlockSpec(memory_space=pltpu.MemorySpace.VMEM),  # w_aug (K_PAD, N_PAD) bf16
    ],
    out_specs=pl.BlockSpec(memory_space=pltpu.MemorySpace.VMEM),
    cost_estimate=pl.CostEstimate(
        flops=2 * M_PAD * K_PAD * N_PAD,
        transcendentals=0,
        bytes_accessed=M_PAD * K_PAD * 2 + K_PAD * N_PAD * 2 + M_PAD * N_PAD * 4,
    ),
)


@jax.jit
def i3d_classifier_forward(x, w_aug):
    """Per-call forward: build the padded/augmented LHS and do one pallas_call."""
    # Dropout is identity in eval mode.
    # TODO(synk): training-mode dropout RNG mask (torch RNG) is not reproduced.
    x2d = x.reshape(B, K_RAW).astype(jnp.bfloat16)
    ones = jnp.ones((B, 1), jnp.bfloat16)                 # bias column (col index K_RAW)
    x_aug = jnp.concatenate([x2d, ones], axis=1)          # (B, K_RAW + 1)
    x_pad = jnp.pad(x_aug, ((0, M_PAD - B), (0, K_PAD - K_RAW - 1)))  # (M_PAD, K_PAD)
    out = _i3d_call(x_pad, w_aug)
    return out[:B, :N_CLASSES]


def reference_forward(x, gamma, beta, running_mean, running_var, w, b):
    """Plain-JAX f32 reference replicating the eval-mode PyTorch forward."""
    pooled = jnp.mean(
        jnp.stack([x[:, :, k:k + L_OUT] for k in range(POOL_K)], axis=0), axis=0)
    rm = running_mean.reshape(1, C, 1)
    rv = running_var.reshape(1, C, 1)
    g = gamma.reshape(1, C, 1)
    be = beta.reshape(1, C, 1)
    y = (pooled - rm) / jnp.sqrt(rv + BN_EPS) * g + be
    flat = y.reshape(B, C * L_OUT)
    return flat @ w.T + b


if __name__ == "__main__":
    key = jax.random.PRNGKey(0)
    kx, kg, kb, km, kv, kw, kbias = jax.random.split(key, 7)

    # Deterministic synthetic parameters (shapes from the module's __init__).
    x = jax.random.normal(kx, (B, C, L), jnp.float32)
    gamma = jax.random.uniform(kg, (C,), jnp.float32, 0.5, 1.5)          # BN weight
    beta = jax.random.normal(kb, (C,), jnp.float32) * 0.1                # BN bias
    running_mean = jax.random.normal(km, (C,), jnp.float32) * 0.1
    running_var = jax.random.uniform(kv, (C,), jnp.float32, 0.5, 1.5)
    bound = 1.0 / jnp.sqrt(float(INPUT_SIZE))
    w = jax.random.uniform(kw, (N_CLASSES, INPUT_SIZE), jnp.float32, -bound, bound)
    b = jax.random.uniform(kbias, (N_CLASSES,), jnp.float32, -bound, bound)

    # One-time folding (model-load path), not part of the per-call forward.
    w_aug = prepare_params(gamma, beta, running_mean, running_var, w, b)
    w_aug = jax.block_until_ready(w_aug)

    out = i3d_classifier_forward(x, w_aug)
    out = jax.block_until_ready(out)

    ref = reference_forward(x, gamma, beta, running_mean, running_var, w, b)
    assert out.shape == (B, N_CLASSES)
    # bf16 inputs / f32 accumulation: tolerance relaxed accordingly vs f32 ref.
    assert jnp.allclose(out, ref, rtol=2e-2, atol=2e-2), "mismatch vs reference"

    print("KERNEL_OK")
</pallas_src>

<mosaic_0001>
module attributes {stable_mosaic.version = 11 : i64} {
  func.func @i3d_classifier_kernel(%arg0: memref<16x128xbf16, #tpu.memory_space<vmem>>, %arg1: memref<128x128xbf16, #tpu.memory_space<vmem>>, %arg2: memref<16x128xf32, #tpu.memory_space<vmem>>) attributes {dimension_semantics = [], scalar_prefetch = 0 : i64, scratch_operands = 0 : i64, tpu.core_type = #tpu.core_type<tc>} {
    %c0 = arith.constant 0 : index
    %c0_0 = arith.constant 0 : index
    %0 = vector.load %arg0[%c0, %c0_0] : memref<16x128xbf16, #tpu.memory_space<vmem>>, vector<16x128xbf16>
    %c0_1 = arith.constant 0 : index
    %c0_2 = arith.constant 0 : index
    %1 = vector.load %arg1[%c0_1, %c0_2] : memref<128x128xbf16, #tpu.memory_space<vmem>>, vector<128x128xbf16>
    %cst = arith.constant dense<0.000000e+00> : vector<16x128xf32>
    %2 = tpu.matmul %0, %1, %cst {dimension_numbers = #tpu.dot_dimension_numbers<[1], [0], [0], [1], [0, 0, 1, 1], [], []>} : vector<16x128xbf16>, vector<128x128xbf16>, vector<16x128xf32> -> vector<16x128xf32>
    %c0_3 = arith.constant 0 : index
    %c0_4 = arith.constant 0 : index
    %3 = vector.load %arg2[%c0_3, %c0_4] : memref<16x128xf32, #tpu.memory_space<vmem>>, vector<16x128xf32>
    tpu.vector_store %arg2[%c0_3, %c0_4], %2 {strides = array<i32>} : memref<16x128xf32, #tpu.memory_space<vmem>>, vector<16x128xf32>,
    return
  }
}

</mosaic_0001>

<bundles_post_ra>
// kernel: i3d_classifier_forward.1
= control target key start
LH: loop header
LB: loop body
LE: loop exit
PB: predicated region body
PF: predicated region fallthrough
CT: control target
= control target key end

     0   :  { %7 = vsyncpa [#allocation3], 0  ;;  %s220_s9 = smov [#allocation2]   ;;  %s252_s0 = inlined_call_operand.vmem [shape: bf16[16,128], index: 0, kind: input, shape index: {}]   ;;  %s253_s1 = inlined_call_operand.hbm [shape: bf16[128,128], index: 1, kind: input, shape index: {}]   ;;  %s254_s2 = inlined_call_operand.vmem [shape: f32[16,128], index: 2, kind: output, shape index: {}]  }
   0x1   :  { %s15_s10 = sshll.u32 %s220_s9, 4  ;;  %s16_s10 = int_to_ptr.vmem [resolvable:$true] %s15_s10 }
   0x2   :  { %s206_s11 = scalar_lea.vmem %s16_s10, 1024  ;;  %p211_p1 = scmp.lt.s32.totalorder %s16_s10, %s16_s10 }
   0x3   :  { %p207_p0 = scmp.ne.s32.totalorder %s16_s10, %s206_s11  ;;  %p212_p2 = scmp.lt.s32.totalorder %s206_s11, %s206_s11 }
   0x5   :  { %p213_p3 = por %p212_p2, %p211_p1 }
   0x7   :  { %p214_p4 = pnand %p213_p3, %p207_p0 }
   0x9   :  { %217 = shalt.err (!%p214_p4)
}
   0xa   :  { %s221_s12 = smov 64   ;;  %s222_s13 = smov 4  }
   0xb   :  { %21 = dma.hbm_to_vmem [thread:$0]  %s253_s1, 1024, %s16_s10, [#allocation3], %s221_s12, %s221_s12, %s222_s13  }
   0xc   :  { %218 = dma.done.wait [#allocation3], 1024  }
   0xd   :  { %219 = vsyncadd [#allocation3], 4294966272  ;;  %v223_v0 = vmov 0.0   ;;  %vm224_vm0 = vmmov 0   ;;  %v189_v1 = vld [vmem:[#allocation2 + $0x38] sm:$0xff]   ;;  %v190_v2 = vld [vmem:[#allocation2 + $0x30] sm:$0xff]  }
   0xe   :  { %164 = vmatprep.subr.bf16.mxu0 %v223_v0  ;;  %180 = vmatprep.mubr.msk.bf16.mxu0 %vm224_vm0, %v223_v0  ;;  %v191_v3 = vld [vmem:[#allocation2 + $0x28] sm:$0xff]   ;;  %v192_v4 = vld [vmem:[#allocation2 + $0x20] sm:$0xff]   ;;  %v193_v5 = vld [vmem:[#allocation2 + $0x18] sm:$0xff]  }
   0xf   :  { %165 = vmatpush3.bf16.msra.mxu0 %v189_v1  ;;  %v194_v6 = vld [vmem:[#allocation2 + $0x10] sm:$0xff]   ;;  %v195_v7 = vld [vmem:[#allocation2 + $0x8] sm:$0xff]   ;;  %v196_v8 = vld [vmem:[#allocation2] sm:$0xff]  }
  0x10   :  { %166 = vmatprep.subr.bf16.mxu0 %v223_v0  ;;  %v197_v9 = vld [vmem:[%s252_s0] sm:$0xff]  }
  0x13   :  { %167 = vmatpush3.bf16.msra.mxu0 %v190_v2 }
  0x14   :  { %168 = vmatprep.subr.bf16.mxu0 %v223_v0 }
  0x17   :  { %169 = vmatpush3.bf16.msra.mxu0 %v191_v3 }
  0x18   :  { %170 = vmatprep.subr.bf16.mxu0 %v223_v0 }
  0x1b   :  { %171 = vmatpush3.bf16.msra.mxu0 %v192_v4 }
  0x1c   :  { %172 = vmatprep.subr.bf16.mxu0 %v223_v0 }
  0x1f   :  { %173 = vmatpush3.bf16.msra.mxu0 %v193_v5 }
  0x20   :  { %174 = vmatprep.subr.bf16.mxu0 %v223_v0 }
  0x23   :  { %175 = vmatpush3.bf16.msra.mxu0 %v194_v6 }
  0x24   :  { %176 = vmatprep.subr.bf16.mxu0 %v223_v0 }
  0x27   :  { %177 = vmatpush3.bf16.msra.mxu0 %v195_v7 }
  0x28   :  { %178 = vmatprep.subr.bf16.mxu0 %v223_v0 }
  0x2b   :  { %179 = vmatpush3.bf16.msra.mxu0 %v196_v8 }
  0x2e   :  { %181 = vmatmul.mubr.bf16.vlgmr.msra.gmra.mxu0 %v197_v9 }
  0xee   :  { %v132_v10 = vpop.f32.mrf.mxu0 }
  0xef   :  { %139 = vst [vmem:[%s254_s2] sm:$0xff] %v132_v10 }
  0xf0   :  { %v182_v11 = vpop.f32.mrf.mxu0 }
  0xf2   :  { %v135_v12 = vpop.f32.mrf.mxu0 }
  0xf3   :  { %140 = vst [vmem:[%s254_s2 + $0x8] sm:$0xff] %v135_v12 }
  0xf4   :  { %v183_v13 = vpop.f32.mrf.mxu0 }
  0xf5   :  { %145 = vsyncpa [#allocation3], 1 }

</bundles_post_ra>
